<compile_context>
chip_gen: v7x
topology: tpu7x:2x2x1
jax: 0.10.0
libtpu: 0.0.40
codegen_flags: <defaults>
</compile_context>

<pallas_src>
import jax
import jax.numpy as jnp
from jax.experimental import pallas as pl
from jax.experimental.pallas import tpu as pltpu

SLAB_ROWS = 200   # multiple of 8  (sublane tile)
SLAB_COLS = 256   # multiple of 128 (lane tile)

# Slab row map (all unused entries are zero):
#   row 0,  cols  0:48   : concat(b1a, b2a, b3a)      layer-1 biases (block-positioned)
#   row 1,  cols  0:144  : concat(b1b, b2b, b3b)      layer-2 biases
#   row 2,  cols  0:16   : b4a                        layer4 Linear(144,16) bias
#   row 3,  cols  0:16   : w4b row                    layer4 Linear(16,1) weight
#   row 4,  cols  0:1    : b4b                        layer4 Linear(16,1) bias
#   row 5,  cols  0:16   : w1a  (branch-a Linear(1,16) weights, block 0:16)
#   row 6,  cols 16:32   : w2a  (branch-b, block 16:32)
#   row 7,  cols 32:48   : w3a  (branch-c, block 32:48)
#   rows  8:56,  cols 0:144 : block-diag(w1b | w2b | w3b)   (48 x 144)
#   rows 56:200, cols 0:16  : w4a                            (144 x 16)


def _leaky_relu(x, slope=0.01):
    # torch.nn.LeakyReLU default negative_slope = 0.01
    return jnp.where(x > 0, x, slope * x)


def net1_kernel(x_ref, slab_ref, out_ref):
    # x_ref: SMEM (3,) f32 = [distance, theta, bs]
    x0 = x_ref[0]
    x1 = x_ref[1]
    x2 = x_ref[2]

    # Layer 1 of all three branches, fused as pure VPU FMAs (no M=1 MXU dots).
    h1 = (x0 * slab_ref[5:6, 0:48]
          + x1 * slab_ref[6:7, 0:48]
          + x2 * slab_ref[7:8, 0:48]
          + slab_ref[0:1, 0:48])
    h1 = _leaky_relu(h1)                                            # (1, 48)

    # Layer 2 of all three branches: block-diagonal weight -> result IS the
    # concatenation d = [a | b | c] (zero blocks contribute exact zeros).
    d = (jnp.dot(h1, slab_ref[8:56, 0:144],
                 preferred_element_type=jnp.float32)
         + slab_ref[1:2, 0:144])                                    # (1, 144)

    # layer4: Linear(144, 16) + LeakyReLU
    h4 = (jnp.dot(d, slab_ref[56:200, 0:16],
                  preferred_element_type=jnp.float32)
          + slab_ref[2:3, 0:16])
    h4 = _leaky_relu(h4)                                            # (1, 16)

    # layer4: Linear(16, 1) as VPU multiply + lane reduce.
    out_ref[...] = (jnp.sum(h4 * slab_ref[3:4, 0:16], axis=-1, keepdims=True)
                    + slab_ref[4:5, 0:1])                           # (1, 1)


def init_params(key):
    """Deterministic synthetic parameters, stored as (in_features, out_features)."""
    def linear(key, fan_in, fan_out):
        kw, kb = jax.random.split(key)
        bound = 1.0 / jnp.sqrt(float(fan_in))
        w = jax.random.uniform(kw, (fan_in, fan_out), jnp.float32, -bound, bound)
        b = jax.random.uniform(kb, (1, fan_out), jnp.float32, -bound, bound)
        return w, b

    ks = jax.random.split(key, 8)
    p = {}
    p["w1a"], p["b1a"] = linear(ks[0], 1, 16)
    p["w1b"], p["b1b"] = linear(ks[1], 16, 64)
    p["w2a"], p["b2a"] = linear(ks[2], 1, 16)
    p["w2b"], p["b2b"] = linear(ks[3], 16, 64)
    p["w3a"], p["b3a"] = linear(ks[4], 1, 16)
    p["w3b"], p["b3b"] = linear(ks[5], 16, 16)
    p["w4a"], p["b4a"] = linear(ks[6], 144, 16)   # 64 + 64 + 16 = 144
    p["w4b"], p["b4b"] = linear(ks[7], 16, 1)
    return p


def pack_params(p):
    """Pack every weight/bias into one pre-padded f32 slab (single DMA)."""
    slab = jnp.zeros((SLAB_ROWS, SLAB_COLS), jnp.float32)
    # biases / small vectors
    slab = slab.at[0, 0:16].set(p["b1a"].reshape(16))
    slab = slab.at[0, 16:32].set(p["b2a"].reshape(16))
    slab = slab.at[0, 32:48].set(p["b3a"].reshape(16))
    slab = slab.at[1, 0:64].set(p["b1b"].reshape(64))
    slab = slab.at[1, 64:128].set(p["b2b"].reshape(64))
    slab = slab.at[1, 128:144].set(p["b3b"].reshape(16))
    slab = slab.at[2, 0:16].set(p["b4a"].reshape(16))
    slab = slab.at[3, 0:16].set(p["w4b"].reshape(16))
    slab = slab.at[4, 0:1].set(p["b4b"].reshape(1))
    # layer-1 weights, block-positioned so the three branches fuse into row FMAs
    slab = slab.at[5, 0:16].set(p["w1a"].reshape(16))
    slab = slab.at[6, 16:32].set(p["w2a"].reshape(16))
    slab = slab.at[7, 32:48].set(p["w3a"].reshape(16))
    # block-diagonal second-layer weight (48, 144)
    slab = slab.at[8:24, 0:64].set(p["w1b"])
    slab = slab.at[24:40, 64:128].set(p["w2b"])
    slab = slab.at[40:56, 128:144].set(p["w3b"])
    # layer4 first Linear (144, 16)
    slab = slab.at[56:200, 0:16].set(p["w4a"])
    return slab


@jax.jit
def net1_forward(distance, theta, bs, slab):
    x = jnp.concatenate([distance.reshape(-1), theta.reshape(-1),
                         bs.reshape(-1)]).astype(jnp.float32)        # (3,)
    out = pl.pallas_call(
        net1_kernel,
        out_shape=jax.ShapeDtypeStruct((1, 1), jnp.float32),
        in_specs=[pl.BlockSpec(memory_space=pltpu.MemorySpace.SMEM),
                  pl.BlockSpec(memory_space=pltpu.MemorySpace.VMEM)],
        out_specs=pl.BlockSpec(memory_space=pltpu.MemorySpace.VMEM),
    )(x, slab)
    # PyTorch returns shape (1,) for the (1,)-shaped 1-D inputs.
    return out.reshape(1)


def net1_reference(distance, theta, bs, params):
    """Pure-JAX reference of the PyTorch forward (sanity check)."""
    def branch(x, w1, b1, w2, b2):
        h = _leaky_relu(x.reshape(1, 1) @ w1 + b1)
        return (h @ w2 + b2)[0]

    a = branch(distance, params["w1a"], params["b1a"], params["w1b"], params["b1b"])
    b = branch(theta,    params["w2a"], params["b2a"], params["w2b"], params["b2b"])
    c = branch(bs,       params["w3a"], params["b3a"], params["w3b"], params["b3b"])
    d = jnp.concatenate([a, b, c], axis=0)             # (144,) == torch concat dim=0
    h4 = _leaky_relu(d[None, :] @ params["w4a"] + params["b4a"])
    return (h4 @ params["w4b"] + params["b4b"]).reshape(1)


if __name__ == "__main__":
    key = jax.random.PRNGKey(0)
    kp, kd, kt, kb = jax.random.split(key, 4)

    params = init_params(kp)
    slab = pack_params(params)

    distance = jax.random.normal(kd, (1,), jnp.float32)
    theta = jax.random.normal(kt, (1,), jnp.float32)
    bs = jax.random.normal(kb, (1,), jnp.float32)

    out = net1_forward(distance, theta, bs, slab)
    out = jax.block_until_ready(out)

    ref = net1_reference(distance, theta, bs, params)
    assert out.shape == (1,), out.shape
    assert jnp.allclose(out, ref, atol=1e-5, rtol=1e-5), (out, ref)

    print("KERNEL_OK")
</pallas_src>

<mosaic_0001>
module attributes {stable_mosaic.version = 11 : i64} {
  func.func @net1_kernel(%arg0: memref<3xf32, #tpu.memory_space<smem>>, %arg1: memref<200x256xf32, #tpu.memory_space<vmem>>, %arg2: memref<1x1xf32, #tpu.memory_space<vmem>>) attributes {dimension_semantics = [], scalar_prefetch = 0 : i64, scratch_operands = 0 : i64, tpu.core_type = #tpu.core_type<tc>} {
    %c0 = arith.constant 0 : index
    %0 = memref.load %arg0[%c0] : memref<3xf32, #tpu.memory_space<smem>>
    %c1 = arith.constant 1 : index
    %1 = memref.load %arg0[%c1] : memref<3xf32, #tpu.memory_space<smem>>
    %c2 = arith.constant 2 : index
    %2 = memref.load %arg0[%c2] : memref<3xf32, #tpu.memory_space<smem>>
    %c5 = arith.constant 5 : index
    %c0_0 = arith.constant 0 : index
    %3 = vector.load %arg1[%c5, %c0_0] : memref<200x256xf32, #tpu.memory_space<vmem>>, vector<1x48xf32>
    %4 = vector.broadcast %0 : f32 to vector<1x48xf32>
    %5 = arith.mulf %4, %3 : vector<1x48xf32>
    %c6 = arith.constant 6 : index
    %c0_1 = arith.constant 0 : index
    %6 = vector.load %arg1[%c6, %c0_1] : memref<200x256xf32, #tpu.memory_space<vmem>>, vector<1x48xf32>
    %7 = vector.broadcast %1 : f32 to vector<1x48xf32>
    %8 = arith.mulf %7, %6 : vector<1x48xf32>
    %9 = arith.addf %5, %8 : vector<1x48xf32>
    %c7 = arith.constant 7 : index
    %c0_2 = arith.constant 0 : index
    %10 = vector.load %arg1[%c7, %c0_2] : memref<200x256xf32, #tpu.memory_space<vmem>>, vector<1x48xf32>
    %11 = vector.broadcast %2 : f32 to vector<1x48xf32>
    %12 = arith.mulf %11, %10 : vector<1x48xf32>
    %13 = arith.addf %9, %12 : vector<1x48xf32>
    %c0_3 = arith.constant 0 : index
    %c0_4 = arith.constant 0 : index
    %14 = vector.load %arg1[%c0_3, %c0_4] : memref<200x256xf32, #tpu.memory_space<vmem>>, vector<1x48xf32>
    %15 = arith.addf %13, %14 : vector<1x48xf32>
    %cst = arith.constant 0.000000e+00 : f32
    %16 = vector.broadcast %cst : f32 to vector<1x48xf32>
    %17 = arith.cmpf ogt, %15, %16 : vector<1x48xf32>
    %cst_5 = arith.constant 0.00999999977 : f32
    %18 = vector.broadcast %cst_5 : f32 to vector<1x48xf32>
    %19 = arith.mulf %18, %15 : vector<1x48xf32>
    %20 = arith.select %17, %15, %19 : vector<1x48xi1>, vector<1x48xf32>
    %c8 = arith.constant 8 : index
    %c0_6 = arith.constant 0 : index
    %21 = vector.load %arg1[%c8, %c0_6] : memref<200x256xf32, #tpu.memory_space<vmem>>, vector<48x144xf32>
    %cst_7 = arith.constant dense<0.000000e+00> : vector<1x144xf32>
    %22 = tpu.matmul %20, %21, %cst_7 {dimension_numbers = #tpu.dot_dimension_numbers<[1], [0], [0], [1], [0, 0, 1, 1], [], []>} : vector<1x48xf32>, vector<48x144xf32>, vector<1x144xf32> -> vector<1x144xf32>
    %c1_8 = arith.constant 1 : index
    %c0_9 = arith.constant 0 : index
    %23 = vector.load %arg1[%c1_8, %c0_9] : memref<200x256xf32, #tpu.memory_space<vmem>>, vector<1x144xf32>
    %24 = arith.addf %22, %23 : vector<1x144xf32>
    %c56 = arith.constant 56 : index
    %c0_10 = arith.constant 0 : index
    %25 = vector.load %arg1[%c56, %c0_10] : memref<200x256xf32, #tpu.memory_space<vmem>>, vector<144x16xf32>
    %cst_11 = arith.constant dense<0.000000e+00> : vector<1x16xf32>
    %26 = tpu.matmul %24, %25, %cst_11 {dimension_numbers = #tpu.dot_dimension_numbers<[1], [0], [0], [1], [0, 0, 1, 1], [], []>} : vector<1x144xf32>, vector<144x16xf32>, vector<1x16xf32> -> vector<1x16xf32>
    %c2_12 = arith.constant 2 : index
    %c0_13 = arith.constant 0 : index
    %27 = vector.load %arg1[%c2_12, %c0_13] : memref<200x256xf32, #tpu.memory_space<vmem>>, vector<1x16xf32>
    %28 = arith.addf %26, %27 : vector<1x16xf32>
    %cst_14 = arith.constant 0.000000e+00 : f32
    %29 = vector.broadcast %cst_14 : f32 to vector<1x16xf32>
    %30 = arith.cmpf ogt, %28, %29 : vector<1x16xf32>
    %cst_15 = arith.constant 0.00999999977 : f32
    %31 = vector.broadcast %cst_15 : f32 to vector<1x16xf32>
    %32 = arith.mulf %31, %28 : vector<1x16xf32>
    %33 = arith.select %30, %28, %32 : vector<1x16xi1>, vector<1x16xf32>
    %c3 = arith.constant 3 : index
    %c0_16 = arith.constant 0 : index
    %34 = vector.load %arg1[%c3, %c0_16] : memref<200x256xf32, #tpu.memory_space<vmem>>, vector<1x16xf32>
    %35 = arith.mulf %33, %34 : vector<1x16xf32>
    %cst_17 = arith.constant dense<0.000000e+00> : vector<1xf32>
    %36 = vector.multi_reduction <add>, %35, %cst_17 [1] : vector<1x16xf32> to vector<1xf32>
    %37 = vector.shape_cast %36 : vector<1xf32> to vector<1x1xf32>
    %c4 = arith.constant 4 : index
    %c0_18 = arith.constant 0 : index
    %38 = vector.load %arg1[%c4, %c0_18] : memref<200x256xf32, #tpu.memory_space<vmem>>, vector<1x1xf32>
    %39 = arith.addf %37, %38 : vector<1x1xf32>
    %c0_19 = arith.constant 0 : index
    %c0_20 = arith.constant 0 : index
    %40 = vector.load %arg2[%c0_19, %c0_20] : memref<1x1xf32, #tpu.memory_space<vmem>>, vector<1x1xf32>
    tpu.vector_store %arg2[%c0_19, %c0_20], %39 {strides = array<i32>} : memref<1x1xf32, #tpu.memory_space<vmem>>, vector<1x1xf32>,
    return
  }
}

</mosaic_0001>

<bundles_post_ra>
// kernel: net1_forward.1
= control target key start
LH: loop header
LB: loop body
LE: loop exit
PB: predicated region body
PF: predicated region fallthrough
CT: control target
= control target key end

     0   :  { %7 = vsyncpa [#allocation5], 0  ;;  %s453_s0 = inlined_call_operand.vmem [shape: f32[3], index: 0, kind: input, shape index: {}]   ;;  %s454_s1 = inlined_call_operand.hbm [shape: f32[200,256], index: 1, kind: input, shape index: {}]   ;;  %s455_s2 = inlined_call_operand.hbm [shape: f32[1,1], index: 2, kind: output, shape index: {}]  }
   0x1   :  { %8 = vsyncpa [#allocation3], 0 }
   0x2   :  { %9 = vsyncpa [#allocation4], 0  ;;  %s16_s11 = sshll.u32 %s453_s0, 4  ;;  %s17_s11 = int_to_ptr.vmem [resolvable:$true] %s16_s11 }
   0x3   :  { %s330_s12 = scalar_lea.vmem %s17_s11, 16  ;;  %p335_p1 = scmp.lt.s32.totalorder %s17_s11, %s17_s11 }
   0x4   :  { %p331_p0 = scmp.ne.s32.totalorder %s17_s11, %s330_s12  ;;  %p336_p2 = scmp.lt.s32.totalorder %s330_s12, %s330_s12 }
   0x6   :  { %p337_p3 = por %p336_p2, %p335_p1 }
   0x8   :  { %p338_p4 = pnand %p337_p3, %p331_p0 }
   0xa   :  { %341 = shalt.err (!%p338_p4)
}
   0xb   :  { %s392_s13 = smov [#allocation2]   ;;  %s393_s14 = smov [#allocation6]  }
   0xc   :  { %19 = dma.vmem_to_smem %s17_s11, 16, %s392_s13, [#allocation5]  }
   0xd   :  { %s25_s15 = sshll.u32 %s393_s14, 4  ;;  %s342_s18 = scalar_lea.hbm %s454_s1, 6400  ;;  %s26_s15 = int_to_ptr.vmem [resolvable:$true] %s25_s15 }
   0xe   :  { %p343_p5 = scmp.ne.s32.totalorder %s454_s1, %s342_s18  ;;  %p346_p6 = scmp.lt.u32.totalorder %s342_s18, %s454_s1 }
  0x10   :  { %p348_p7 = pnand %p346_p6, %p343_p5 }
  0x12   :  { %351 = shalt.err (!%p348_p7)
}
  0x13   :  { %s352_s22 = scalar_lea.vmem %s26_s15, 6400  ;;  %p357_p9 = scmp.lt.s32.totalorder %s26_s15, %s26_s15 }
  0x14   :  { %p353_p8 = scmp.ne.s32.totalorder %s26_s15, %s352_s22  ;;  %p358_p10 = scmp.lt.s32.totalorder %s352_s22, %s352_s22 }
  0x16   :  { %p359_p11 = por %p358_p10, %p357_p9 }
  0x18   :  { %p360_p12 = pnand %p359_p11, %p353_p8 }
  0x1a   :  { %363 = shalt.err (!%p360_p12)
}
  0x1b   :  { %s394_s23 = smov 256   ;;  %s395_s24 = smov 16  }
  0x1c   :  { %31 = dma.hbm_to_vmem [thread:$0]  %s454_s1, 6400, %s26_s15, [#allocation3], %s394_s23, %s394_s23, %s395_s24  }
  0x1d   :  { %386 = dma.done.wait [#allocation5], 16  }
  0x1e   :  { %387 = vsyncadd [#allocation5], 4294967280 }
  0x1f   :  { %388 = dma.done.wait [#allocation3], 6400  }
  0x20   :  { %389 = vsyncadd [#allocation3], 4294960896 }
  0x21   :  { %38 = sfence }
  0x22   :  { %v59_v0 = vld [vmem:[#allocation6 + $0x18] sm:$0xff]  ;;  %v61_v1 = vld [vmem:[#allocation6 + $0x28] sm:$0xff]  ;;  %v58_v2 = vld [vmem:[#allocation6 + $0x10] sm:$0xff]  ;;  %s429_s27 = sld [smem:[#allocation2]]  ;;  %v396_v7 = vmov 0.0   ;;  %s280_s28 = sld [smem:[#allocation2 + $0x1]]  ;;  %v73_v62 = vlaneseq }
  0x23   :  { %v284_v3 = vpack.c.bf16 %v61_v1, %v59_v0  ;;  %v60_v4 = vld [vmem:[#allocation6 + $0x20] sm:$0xff]  ;;  %v63_v5 = vld [vmem:[#allocation6 + $0x38] sm:$0xff]  ;;  %v65_v6 = vld [vmem:[#allocation6 + $0x48] sm:$0xff]  ;;  %151 = vmatprep.mubr.f32.mxu0 %v396_v7  ;;  %s281_s1 = sld [smem:[#allocation2 + $0x2]]  ;;  %v397_v14 = vmov 0.0|0.0   ;;  %vm83_vm1 = vcmask 392192  }
  0x24   :  { %v286_v8 = vpack.c.bf16 %v60_v4, %v58_v2  ;;  %v288_v9 = vpack.c.bf16 %v65_v6, %v63_v5  ;;  %v62_v10 = vld [vmem:[#allocation6 + $0x30] sm:$0xff]  ;;  %v64_v11 = vld [vmem:[#allocation6 + $0x40] sm:$0xff]  ;;  %v67_v12 = vld [vmem:[#allocation6 + $0x58] sm:$0xff]  ;;  %296 = vmatprep.subr.bf16.mxu1 %v397_v14  ;;  %v74_v63 = vshrl.u32 %v73_v62, 7  ;;  %vm177_vm2 = vcmask 130048   ;;  %s398_s29 = smov [#allocation7]  }
  0x25   :  { %285 = vmatprep.subr.bf16.mxu0 %v284_v3  ;;  %v69_v13 = vld [vmem:[#allocation6 + $0x68] sm:$0xff]  ;;  %v290_v15 = vpack.c.bf16 %v64_v11, %v62_v10  ;;  %v66_v16 = vld [vmem:[#allocation6 + $0x50] sm:$0xff]  ;;  %v68_v17 = vld [vmem:[#allocation6 + $0x60] sm:$0xff]  ;;  %vm256_vm4 = vcmask 122880   ;;  %s270_s30 = sshll.u32 %s398_s29, 4  ;;  %vm262_vm5 = vcmask 0   ;;  %s271_s30 = int_to_ptr.vmem [resolvable:$true] %s270_s30 }
  0x26   :  { %287 = vmatpush1.bf16.msra.mxu0 %v286_v8  ;;  %v42_v18 = vld [vmem:[#allocation6 + $0x5] ss:$0 sm:$0xff]  ;;  %v292_v19 = vpack.c.bf16 %v69_v13, %v67_v12  ;;  %v45_v20 = vld [vmem:[#allocation6 + $0x6] ss:$0 sm:$0xff]  ;;  %v158_v21 = vld [vmem:[#allocation6 + $0x70] sm:$0xff]  ;;  %v294_v30 = vpack.c.bf16 %v68_v17, %v66_v16  ;;  %v79_v0 = vsub.s32 1, %v74_v63  ;;  %p369_p0 = scmp.lt.s32.totalorder %s271_s30, %s271_s30 }
  0x27   :  { %289 = vmatprep.subr.bf16.mxu0 %v288_v9  ;;  %v159_v22 = vld [vmem:[#allocation6 + $0x80] sm:$0xff]  ;;  %v160_v26 = vld [vmem:[#allocation6 + $0x90] sm:$0xff]  ;;  %v75_v2 = vsub.s32 0, %v74_v63  ;;  %s364_s3 = scalar_lea.vmem %s271_s30, 16  ;;  %s368_s4 = scalar_lea.vmem %s271_s30, 32 }
  0x28   :  { %v43_v23 = vstv %s429_s27  ;;  %v49_v24 = vld [vmem:[#allocation6 + $0x7] ss:$0 sm:$0xff]  ;;  %v297_v25 = vpack.c.bf16 %v159_v22, %v158_v21  ;;  %v46_v29 = vstv %s280_s28  ;;  %v162_v35 = vld [vmem:[#allocation6 + $0xb0] sm:$0xff]  ;;  %v53_v38 = vld [vmem:[#allocation6] ss:$0 sm:$0xff]  ;;  %p365_p13 = scmp.ne.s32.totalorder %s271_s30, %s364_s3  ;;  %p370_p1 = scmp.lt.s32.totalorder %s368_s4, %s364_s3 }
  0x29   :  { %v161_v27 = vld [vmem:[#allocation6 + $0xa0] sm:$0xff]  ;;  %v44_v28 = vmul.f32 %v43_v23, %v42_v18  ;;  %v47_v31 = vmul.f32 %v46_v29, %v45_v20  ;;  %v50_v32 = vstv %s281_s1  ;;  %v164_v41 = vld [vmem:[#allocation6 + $0xd0] sm:$0xff] }
  0x2a   :  { %291 = vmatpush1.bf16.msra.mxu0 %v290_v15  ;;  %298 = vmatpush1.bf16.msra.mxu1 %v297_v25  ;;  %v300_v33 = vpack.c.bf16 %v161_v27, %v160_v26  ;;  %v51_v34 = vmul.f32 %v50_v32, %v49_v24  ;;  %v163_v36 = vld [vmem:[#allocation6 + $0xc0] sm:$0xff]  ;;  %v166_v46 = vld [vmem:[#allocation6 + $0xf0] sm:$0xff]  ;;  %p371_p2 = por %p370_p1, %p369_p0 }
  0x2b   :  { %293 = vmatprep.subr.bf16.mxu0 %v292_v19  ;;  %299 = vmatprep.subr.bf16.mxu1 %v397_v14  ;;  %v48_v37 = vadd.f32 %v47_v31, %v44_v28  ;;  %v303_v40 = vpack.c.bf16 %v163_v36, %v162_v35  ;;  %v165_v42 = vld [vmem:[#allocation6 + $0xe0] sm:$0xff]  ;;  %v168_v50 = vld [vmem:[#allocation6 + $0x110] sm:$0xff] }
  0x2c   :  { %v306_v45 = vpack.c.bf16 %v165_v42, %v164_v41  ;;  %v167_v47 = vld [vmem:[#allocation6 + $0x100] sm:$0xff]  ;;  %v170_v53 = vld [vmem:[#allocation6 + $0x130] sm:$0xff]  ;;  %p372_p3 = pnand %p371_p2, %p365_p13 }
  0x2d   :  { %v52_v39 = vadd.f32 %v51_v34, %v48_v37  ;;  %v309_v49 = vpack.c.bf16 %v167_v47, %v166_v46  ;;  %v169_v51 = vld [vmem:[#allocation6 + $0x120] sm:$0xff]  ;;  %v172_v56 = vld [vmem:[#allocation6 + $0x150] sm:$0xff] }
  0x2e   :  { %295 = vmatpush1.bf16.msra.mxu0 %v294_v30  ;;  %301 = vmatpush1.bf16.msra.mxu1 %v300_v33  ;;  %v312_v52 = vpack.c.bf16 %v169_v51, %v168_v50  ;;  %v171_v54 = vld [vmem:[#allocation6 + $0x140] sm:$0xff]  ;;  %v174_v59 = vld [vmem:[#allocation6 + $0x170] sm:$0xff] }
  0x2f   :  { %302 = vmatprep.subr.bf16.mxu1 %v397_v14  ;;  %v54_v43 = vadd.f32 %v53_v38, %v52_v39  ;;  %v315_v55 = vpack.c.bf16 %v171_v54, %v170_v53  ;;  %v173_v57 = vld [vmem:[#allocation6 + $0x160] sm:$0xff] }
  0x30   :  { %v318_v58 = vpack.c.bf16 %v173_v57, %v172_v56  ;;  %v175_v60 = vld [vmem:[#allocation6 + $0x180] sm:$0xff] }
  0x31   :  { %vm55_vm0 = vcmp.gt.f32.partialorder %v54_v43, 0.0  ;;  %v56_v44 = vmul.f32 0.01, %v54_v43  ;;  %v321_v61 = vpack.c.bf16 %v175_v60, %v174_v59  ;;  %v71_v1 = vld [vmem:[#allocation6 + $0x1] ss:$8 sm:$0x3] }
  0x32   :  { %304 = vmatpush1.bf16.msra.mxu1 %v303_v40  ;;  %v80_v3 = vrot.slane %v71_v1, %v79_v0  ;;  %v76_v4 = vrot.slane %v71_v1, %v75_v2  ;;  %v176_v9 = vld [vmem:[#allocation6 + $0x2] ss:$0 sm:$0xff]  ;;  %v260_v18 = vld [vmem:[#allocation6 + $0x4] ss:$0 sm:$0xff] }
  0x33   :  { %305 = vmatprep.subr.bf16.mxu1 %v397_v14  ;;  %v57_v48 = vsel %vm55_vm0, %v54_v43, %v56_v44 }
  0x34   :  { %282 = vmatmul.mubr.msk.f32.vlgmr.msra.gmra.mrb[0].mxu0 %vm83_vm1, %v57_v48 }
  0x36   :  { %307 = vmatpush1.bf16.msra.mxu1 %v306_v45 }
  0x37   :  { %308 = vmatprep.subr.bf16.mxu1 %v397_v14 }
  0x3a   :  { %310 = vmatpush1.bf16.msra.mxu1 %v309_v49 }
  0x3b   :  { %311 = vmatprep.subr.bf16.mxu1 %v397_v14 }
  0x3e   :  { %313 = vmatpush1.bf16.msra.mxu1 %v312_v52 }
  0x3f   :  { %314 = vmatprep.subr.bf16.mxu1 %v397_v14 }
  0x42   :  { %316 = vmatpush1.bf16.msra.mxu1 %v315_v55 }
  0x43   :  { %317 = vmatprep.subr.bf16.mxu1 %v397_v14 }
  0x46   :  { %319 = vmatpush1.bf16.msra.mxu1 %v318_v58 }
  0x47   :  { %320 = vmatprep.subr.bf16.mxu1 %v397_v14  ;;  %v254_v14 = vld [vmem:[#allocation6 + $0x3] ss:$0 sm:$0xff] }
  0x4a   :  { %322 = vmatpush1.bf16.msra.mxu1 %v321_v61 }
 0x107   :  { %v153_v5 = vpop.f32.mrb[0].mxu0 }
 0x108   :  { %v155_v6 = vpop.f32.mrb[1].mxu0  ;;  %v154_v8 = vadd.f32 %v153_v5, %v76_v4 }
 0x109   :  { %v156_v7 = vadd.f32 %v155_v6, %v80_v3 }
 0x10b   :  { %283 = vmatprep.mubr.msk.f32.mxu1 %vm177_vm2, %v156_v7 }
 0x10c   :  { %246 = vmatmul.mubr.f32.vlgmr.msra.gmra.mrb[0].mxu1 %v154_v8 }
 0x1df   :  { %v247_v10 = vpop.f32.mrb[0].mxu1 }
 0x1e0   :  { %v248_v11 = vadd.f32 %v247_v10, %v176_v9  ;;  %v249_v12 = vpop.f32.mrb[1].mxu1 }
 0x1e2   :  { %v252_v13 = vmul.f32 0.01, %v248_v11  ;;  %vm251_vm3 = vcmp.gt.f32.partialorder %v248_v11, 0.0 }
 0x1e4   :  { %v253_v15 = vsel %vm251_vm3, %v248_v11, %v252_v13 }
 0x1e5   :  { %v255_v16 = vmul.f32 %v254_v14, %v253_v15 }
 0x1e7   :  { %v257_v17 = vsel %vm256_vm4, %v255_v16, 0.0 }
 0x1e8   :  { %258 = vadd.xlane.f32.xlu0 %v257_v17 }
 0x275   :  { %v259_v19 = vpop.xlane.xlu0 %258 }
 0x276   :  { %v261_v20 = vadd.f32 %v260_v18, %v259_v19 }
 0x278   :  { %263 = vst.msk [vmem:[#allocation7] sm:$0x1] %vm262_vm5, %v261_v20 }
 0x279   :  { %375 = shalt.err (!%p372_p3)
}
 0x27a   :  { %s376_s7 = scalar_lea.hbm %s455_s2, 16 }
 0x27b   :  { %p377_p4 = scmp.ne.s32.totalorder %s455_s2, %s376_s7  ;;  %p380_p5 = scmp.lt.u32.totalorder %s376_s7, %s455_s2 }
 0x27d   :  { %p382_p6 = pnand %p380_p5, %p377_p4 }
 0x27f   :  { %385 = shalt.err (!%p382_p6)
}
 0x280   :  { %273 = dma.vmem_to_hbm [thread:$0]  %s271_s30, 16, %s455_s2, [#allocation4]  }
 0x281   :  { %390 = dma.done.wait [#allocation4], 16  }
 0x282   :  { %391 = vsyncadd [#allocation4], 4294967280 }
 0x283   :  { %277 = vsyncpa [#allocation3], 1 }
 0x284   :  { %278 = vsyncpa [#allocation4], 1 }
 0x285   :  { %279 = vsyncpa [#allocation5], 1 }

</bundles_post_ra>
